<compile_context>
chip_gen: v6e
topology: v6e:2x2x1
jax: 0.10.0
libtpu: 0.0.40
codegen_flags: <defaults>
</compile_context>

<pallas_src>
import functools

import jax
import jax.numpy as jnp
from jax.experimental import pallas as pl
from jax.experimental.pallas import tpu as pltpu

NEG_INF = -1e30
F_PAD = 128            # lane-dense feature padding (all layer widths <= 126)
ER_COL = F_PAD - 1     # packed column of W holding W @ attn_r^T


def _gat_fused_kernel(x_ref, adjb_ref,
                      w0_ref, al0_ref, b0_ref,
                      w1_ref, al1_ref, b1_ref,
                      w2_ref, al2_ref, b2_ref,
                      out_ref, z_ref, *, tile, n_tiles):
    """Fused 3-layer GAT forward. adjb is the additive (dst, src) edge bias (bf16)."""

    def layer(h16, w_ref, al_ref, b_ref, apply_elu):
        # z = h @ W_packed : (Np, F_PAD), bf16 MXU path with f32 accumulation.
        # Column ER_COL of W_packed holds W @ attn_r^T, so z[:, ER_COL] == er.
        z32 = jnp.dot(h16, w_ref[...], preferred_element_type=jnp.float32)
        # Source term el[u] = attn_l . z[u] as a (1, Np) row (broadcast over dst).
        el_row = jax.lax.dot_general(al_ref[...], z32, (((1,), (1,)), ((), ())),
                                     preferred_element_type=jnp.float32)
        z_ref[...] = z32.astype(jnp.bfloat16)          # aggregation operand (bf16)
        bias = b_ref[...]                               # (1, F_PAD) f32

        def dst_tile(t, carry):
            r0 = pl.multiple_of(t * tile, tile)
            z_t = z_ref[pl.ds(r0, tile), :]                                # (T, F_PAD)
            er_col = z_t[:, ER_COL:ER_COL + 1].astype(jnp.float32)         # (T, 1)
            logits = er_col + el_row                                       # (T, Np)
            logits = jnp.maximum(logits, 0.2 * logits)                     # leaky_relu(0.2)
            # bf16 mask cast fuses into the add; no persistent f32 adj copy.
            logits = logits + adjb_ref[pl.ds(r0, tile), :].astype(jnp.float32)
            lmax = jnp.max(logits, axis=-1, keepdims=True)                 # (T, 1)
            p = jnp.exp(logits - lmax)                                     # masked -> 0
            denom = jnp.sum(p, axis=-1, keepdims=True)                     # >= 1 (self-loops)
            rst = jnp.dot(p.astype(jnp.bfloat16), z_ref[...],
                          preferred_element_type=jnp.float32)              # (T, F_PAD)
            rst = rst * pl.reciprocal(denom, approx=True) + bias
            if apply_elu:
                rst = jnp.where(rst > 0, rst, jnp.exp(jnp.minimum(rst, 0.0)) - 1.0)
            out_ref[pl.ds(r0, tile), :] = rst
            return carry

        jax.lax.fori_loop(0, n_tiles, dst_tile, 0)

    layer(x_ref[...], w0_ref, al0_ref, b0_ref, True)                          # layer 0 + ELU
    layer(out_ref[...].astype(jnp.bfloat16), w1_ref, al1_ref, b1_ref, True)   # layer 1 + ELU
    layer(out_ref[...].astype(jnp.bfloat16), w2_ref, al2_ref, b2_ref, False)  # layer 2


# ------------------------- packing (once per graph / params) -------------------------
def _round_up(a, b):
    return (a + b - 1) // b * b


def gat_pack_graph(adj, n_pad):
    """(dst, src) additive bias in bf16. Padded dst rows get a synthetic self-loop
    so their softmax denominator is >= 1 (keeps h finite; they never feed real rows)."""
    n = adj.shape[0]
    adj_t = jnp.zeros((n_pad, n_pad), adj.dtype).at[:n, :n].set(adj.T)
    idx = jnp.arange(n_pad)
    pad_self = (idx[:, None] == idx[None, :]) & (idx[:, None] >= n)
    return jnp.where((adj_t > 0) | pad_self, 0.0, NEG_INF).astype(jnp.bfloat16)


def gat_pack_params(params):
    """Pad per-layer params to F_PAD lanes; fold W @ attn_r^T into W's last column."""
    flat = []
    for p in params:
        w = p["w"].astype(jnp.float32)
        fi, fo = w.shape
        assert fi <= F_PAD and fo <= ER_COL - 1, (fi, fo)
        wp = jnp.zeros((F_PAD, F_PAD), jnp.float32)
        wp = wp.at[:fi, :fo].set(w)
        wp = wp.at[:fi, ER_COL].set((w @ p["attn_r"].reshape(fo, 1))[:, 0])
        al = jnp.zeros((1, F_PAD), jnp.float32).at[:, :fo].set(p["attn_l"].astype(jnp.float32))
        b = jnp.zeros((1, F_PAD), jnp.float32).at[:, :fo].set(p["bias"].astype(jnp.float32))
        flat += [wp.astype(jnp.bfloat16), al, b]
    return flat


# --------------------------------- forward (per call) --------------------------------
def gat_apply(adjb, flat_params, inputs, out_size, *, tile, n_pad):
    n, f_in = inputs.shape
    n_tiles = n_pad // tile
    xp = jnp.zeros((n_pad, F_PAD), jnp.bfloat16).at[:n, :f_in].set(
        inputs.astype(jnp.bfloat16))

    # VMEM working-set estimate -> scoped limit, clamped to physical capacity (v7x-safe).
    param_bytes = sum(int(a.size) * a.dtype.itemsize for a in flat_params)
    work = (2 * n_pad * n_pad                       # adjb (bf16, persistent)
            + (2 + 4 + 2 + 4) * n_pad * F_PAD       # x, out, z scratch, live z32
            + param_bytes
            + 3 * 4 * tile * n_pad)                 # logits / p / tmp tiles (f32)
    try:
        phys = int(pltpu.get_tpu_info().vmem_capacity_bytes)
    except Exception:
        phys = 64 * 1024 * 1024                     # v7x per-core floor
    vmem_limit = int(min(max(work * 3 // 2, 32 * 1024 * 1024), int(phys * 0.9)))

    flops = 3 * (2 * n_pad * F_PAD * F_PAD          # z = h @ W
                 + 2 * n_pad * F_PAD                # el row
                 + 2 * n_pad * n_pad * F_PAD        # p @ z
                 + 8 * n_pad * n_pad)               # N^2 elementwise chain
    cost = pl.CostEstimate(
        flops=int(flops),
        transcendentals=int(3 * (n_pad * n_pad + n_pad * F_PAD)),
        bytes_accessed=int(2 * n_pad * n_pad + 6 * n_pad * F_PAD + param_bytes))

    vmem = pl.BlockSpec(memory_space=pltpu.MemorySpace.VMEM)
    out = pl.pallas_call(
        functools.partial(_gat_fused_kernel, tile=tile, n_tiles=n_tiles),
        out_shape=jax.ShapeDtypeStruct((n_pad, F_PAD), jnp.float32),
        in_specs=[vmem] * (2 + len(flat_params)),
        out_specs=vmem,
        scratch_shapes=[pltpu.VMEM((n_pad, F_PAD), jnp.bfloat16)],
        compiler_params=pltpu.CompilerParams(vmem_limit_bytes=vmem_limit),
        cost_estimate=cost,
    )(xp, adjb, *flat_params)
    return out[:n, :out_size]


def gat_forward(adj, inputs, params, out_size, *, tile=256):
    """Convenience wrapper: packing (once-per-graph work) + apply."""
    n = inputs.shape[0]
    t = min(tile, _round_up(n, 8))
    n_pad = _round_up(n, t)
    adjb = gat_pack_graph(adj, n_pad)
    flat = gat_pack_params(params)
    return gat_apply(adjb, flat, inputs, out_size, tile=t, n_pad=n_pad)


# --------------- pure-JAX reference (original orientation, exact math) ---------------
def _gat_layer_ref(x, w, al, ar, b, adj, apply_elu):
    z = x @ w
    el = jnp.sum(z * al, axis=-1, keepdims=True)              # (N, 1) source term
    er = jnp.sum(z * ar, axis=-1, keepdims=True).T             # (1, N) destination term
    logits = el + er                                           # (src, dst)
    logits = jnp.where(logits > 0, logits, 0.2 * logits)
    mask = adj > 0
    logits = jnp.where(mask, logits, NEG_INF)
    lmax = jnp.max(logits, axis=0, keepdims=True)
    p = jnp.where(mask, jnp.exp(logits - lmax), 0.0)
    alpha = p / jnp.maximum(jnp.sum(p, axis=0, keepdims=True), 1e-9)
    rst = alpha.T @ z + b
    if apply_elu:
        rst = jnp.where(rst > 0, rst, jnp.exp(jnp.minimum(rst, 0.0)) - 1.0)
    return rst


def gat_forward_ref(adj, inputs, params):
    h = inputs
    for i, p in enumerate(params):
        h = _gat_layer_ref(h, p["w"], p["attn_l"], p["attn_r"], p["bias"], adj, i != 2)
    return h


if __name__ == "__main__":
    N = 32
    # The PyTorch module feeds layer-1 (declared in_size) with layer-0's output
    # (hid_size * heads[0]) — it only type-checks when in_size == hid_size.
    in_size = 16
    hid_size = 16
    out_size = 8

    key = jax.random.PRNGKey(0)
    k_x, k_adj, *k_params = jax.random.split(key, 2 + 3 * 4)

    x = jax.random.normal(k_x, (N, in_size), jnp.float32)
    adj = (jax.random.uniform(k_adj, (N, N)) < 0.15).astype(jnp.float32)
    adj = jnp.maximum(adj, jnp.eye(N, dtype=jnp.float32))      # self-loops (required)

    dims = [(in_size, hid_size), (in_size, hid_size), (hid_size, out_size)]
    params = []
    for li, (fi, fo) in enumerate(dims):
        kw, kl, kr, kb = k_params[4 * li:4 * li + 4]
        params.append(dict(
            w=0.3 * jax.random.normal(kw, (fi, fo), jnp.float32),
            attn_l=0.3 * jax.random.normal(kl, (1, fo), jnp.float32),
            attn_r=0.3 * jax.random.normal(kr, (1, fo), jnp.float32),
            bias=0.1 * jax.random.normal(kb, (1, fo), jnp.float32),
        ))

    # Per-graph / per-parameter packing hoisted out of the forward call.
    tile = min(256, _round_up(N, 8))
    n_pad = _round_up(N, tile)
    adjb = gat_pack_graph(adj, n_pad)
    flat = gat_pack_params(params)
    fwd = jax.jit(functools.partial(gat_apply, out_size=out_size, tile=tile, n_pad=n_pad))

    out = jax.block_until_ready(fwd(adjb, flat, x))
    ref = jax.block_until_ready(gat_forward_ref(adj, x, params))

    assert out.shape == (N, out_size), out.shape
    # Tolerance covers bf16 matmul operands + EUP approximate reciprocal across 3 layers.
    err = float(jnp.max(jnp.abs(out - ref)))
    assert jnp.allclose(out, ref, atol=5e-2, rtol=5e-2), err
    print("KERNEL_OK")
</pallas_src>

<mosaic_0001>
module attributes {stable_mosaic.version = 11 : i64} {
  func.func @_gat_fused_kernel(%arg0: memref<32x128xbf16, #tpu.memory_space<vmem>>, %arg1: memref<32x32xbf16, #tpu.memory_space<vmem>>, %arg2: memref<128x128xbf16, #tpu.memory_space<vmem>>, %arg3: memref<1x128xf32, #tpu.memory_space<vmem>>, %arg4: memref<1x128xf32, #tpu.memory_space<vmem>>, %arg5: memref<128x128xbf16, #tpu.memory_space<vmem>>, %arg6: memref<1x128xf32, #tpu.memory_space<vmem>>, %arg7: memref<1x128xf32, #tpu.memory_space<vmem>>, %arg8: memref<128x128xbf16, #tpu.memory_space<vmem>>, %arg9: memref<1x128xf32, #tpu.memory_space<vmem>>, %arg10: memref<1x128xf32, #tpu.memory_space<vmem>>, %arg11: memref<32x128xf32, #tpu.memory_space<vmem>>, %arg12: memref<32x128xbf16, #tpu.memory_space<vmem>>) attributes {dimension_semantics = [], scalar_prefetch = 0 : i64, scratch_operands = 1 : i64, tpu.core_type = #tpu.core_type<tc>} {
    %c0 = arith.constant 0 : index
    %c0_0 = arith.constant 0 : index
    %0 = vector.load %arg0[%c0, %c0_0] : memref<32x128xbf16, #tpu.memory_space<vmem>>, vector<32x128xbf16>
    %c0_1 = arith.constant 0 : index
    %c0_2 = arith.constant 0 : index
    %1 = vector.load %arg2[%c0_1, %c0_2] : memref<128x128xbf16, #tpu.memory_space<vmem>>, vector<128x128xbf16>
    %cst = arith.constant dense<0.000000e+00> : vector<32x128xf32>
    %2 = tpu.matmul %0, %1, %cst {dimension_numbers = #tpu.dot_dimension_numbers<[1], [0], [0], [1], [0, 0, 1, 1], [], []>} : vector<32x128xbf16>, vector<128x128xbf16>, vector<32x128xf32> -> vector<32x128xf32>
    %c0_3 = arith.constant 0 : index
    %c0_4 = arith.constant 0 : index
    %3 = vector.load %arg3[%c0_3, %c0_4] : memref<1x128xf32, #tpu.memory_space<vmem>>, vector<1x128xf32>
    %cst_5 = arith.constant dense<0.000000e+00> : vector<1x32xf32>
    %4 = tpu.matmul %3, %2, %cst_5 {dimension_numbers = #tpu.dot_dimension_numbers<[1], [1], [0], [0], [0, 0, 1, 0], [], []>} : vector<1x128xf32>, vector<32x128xf32>, vector<1x32xf32> -> vector<1x32xf32>
    %5 = arith.truncf %2 : vector<32x128xf32> to vector<32x128xbf16>
    %c0_6 = arith.constant 0 : index
    %c0_7 = arith.constant 0 : index
    %6 = vector.load %arg12[%c0_6, %c0_7] : memref<32x128xbf16, #tpu.memory_space<vmem>>, vector<32x128xbf16>
    tpu.vector_store %arg12[%c0_6, %c0_7], %5 {strides = array<i32>} : memref<32x128xbf16, #tpu.memory_space<vmem>>, vector<32x128xbf16>,
    %c0_8 = arith.constant 0 : index
    %c0_9 = arith.constant 0 : index
    %7 = vector.load %arg4[%c0_8, %c0_9] : memref<1x128xf32, #tpu.memory_space<vmem>>, vector<1x128xf32>
    %c0_i32 = arith.constant 0 : i32
    %c32_i32 = arith.constant 32 : i32
    %8 = arith.muli %c0_i32, %c32_i32 : i32
    %9 = tpu.assume_multiple %8, 32 : i32
    %10 = arith.index_cast %9 : i32 to index
    %c0_10 = arith.constant 0 : index
    %11 = vector.load %arg12[%10, %c0_10] : memref<32x128xbf16, #tpu.memory_space<vmem>>, vector<32x128xbf16>
    %12 = vector.extract_strided_slice %11 {offsets = [0, 127], sizes = [32, 1], strides = [1, 1]} : vector<32x128xbf16> to vector<32x1xbf16>
    %13 = arith.extf %12 : vector<32x1xbf16> to vector<32x1xf32>
    %14 = vector.broadcast %13 : vector<32x1xf32> to vector<32x32xf32>
    %15 = vector.broadcast %4 : vector<1x32xf32> to vector<32x32xf32>
    %16 = arith.addf %14, %15 : vector<32x32xf32>
    %cst_11 = arith.constant 2.000000e-01 : f32
    %17 = vector.broadcast %cst_11 : f32 to vector<32x32xf32>
    %18 = arith.mulf %17, %16 : vector<32x32xf32>
    %19 = arith.maximumf %16, %18 : vector<32x32xf32>
    %20 = arith.index_cast %9 : i32 to index
    %c0_12 = arith.constant 0 : index
    %21 = vector.load %arg1[%20, %c0_12] : memref<32x32xbf16, #tpu.memory_space<vmem>>, vector<32x32xbf16>
    %22 = arith.extf %21 : vector<32x32xbf16> to vector<32x32xf32>
    %23 = arith.addf %19, %22 : vector<32x32xf32>
    %cst_13 = arith.constant dense<0xFF800000> : vector<32xf32>
    %24 = vector.multi_reduction <maximumf>, %23, %cst_13 [1] : vector<32x32xf32> to vector<32xf32>
    %25 = vector.shape_cast %24 : vector<32xf32> to vector<32x1xf32>
    %26 = vector.broadcast %25 : vector<32x1xf32> to vector<32x32xf32>
    %27 = arith.subf %23, %26 : vector<32x32xf32>
    %28 = math.exp %27 : vector<32x32xf32>
    %cst_14 = arith.constant dense<0.000000e+00> : vector<32xf32>
    %29 = vector.multi_reduction <add>, %28, %cst_14 [1] : vector<32x32xf32> to vector<32xf32>
    %30 = vector.shape_cast %29 : vector<32xf32> to vector<32x1xf32>
    %31 = arith.truncf %28 : vector<32x32xf32> to vector<32x32xbf16>
    %c0_15 = arith.constant 0 : index
    %c0_16 = arith.constant 0 : index
    %32 = vector.load %arg12[%c0_15, %c0_16] : memref<32x128xbf16, #tpu.memory_space<vmem>>, vector<32x128xbf16>
    %cst_17 = arith.constant dense<0.000000e+00> : vector<32x128xf32>
    %33 = tpu.matmul %31, %32, %cst_17 {dimension_numbers = #tpu.dot_dimension_numbers<[1], [0], [0], [1], [0, 0, 1, 1], [], []>} : vector<32x32xbf16>, vector<32x128xbf16>, vector<32x128xf32> -> vector<32x128xf32>
    %34 = tpu.reciprocal %30 {approx = true} : vector<32x1xf32> -> vector<32x1xf32>
    %35 = vector.broadcast %34 : vector<32x1xf32> to vector<32x128xf32>
    %36 = arith.mulf %33, %35 : vector<32x128xf32>
    %37 = vector.broadcast %7 : vector<1x128xf32> to vector<32x128xf32>
    %38 = arith.addf %36, %37 : vector<32x128xf32>
    %cst_18 = arith.constant 0.000000e+00 : f32
    %39 = vector.broadcast %cst_18 : f32 to vector<32x128xf32>
    %40 = arith.cmpf ogt, %38, %39 : vector<32x128xf32>
    %cst_19 = arith.constant 0.000000e+00 : f32
    %41 = vector.broadcast %cst_19 : f32 to vector<32x128xf32>
    %42 = arith.minimumf %38, %41 : vector<32x128xf32>
    %43 = math.exp %42 : vector<32x128xf32>
    %cst_20 = arith.constant 1.000000e+00 : f32
    %44 = vector.broadcast %cst_20 : f32 to vector<32x128xf32>
    %45 = arith.subf %43, %44 : vector<32x128xf32>
    %46 = arith.select %40, %38, %45 : vector<32x128xi1>, vector<32x128xf32>
    %47 = arith.index_cast %9 : i32 to index
    %c0_21 = arith.constant 0 : index
    %48 = vector.load %arg11[%47, %c0_21] : memref<32x128xf32, #tpu.memory_space<vmem>>, vector<32x128xf32>
    tpu.vector_store %arg11[%47, %c0_21], %46 {strides = array<i32>} : memref<32x128xf32, #tpu.memory_space<vmem>>, vector<32x128xf32>,
    %c1_i32 = arith.constant 1 : i32
    %c0_22 = arith.constant 0 : index
    %c0_23 = arith.constant 0 : index
    %49 = vector.load %arg11[%c0_22, %c0_23] : memref<32x128xf32, #tpu.memory_space<vmem>>, vector<32x128xf32>
    %50 = arith.truncf %49 : vector<32x128xf32> to vector<32x128xbf16>
    %c0_24 = arith.constant 0 : index
    %c0_25 = arith.constant 0 : index
    %51 = vector.load %arg5[%c0_24, %c0_25] : memref<128x128xbf16, #tpu.memory_space<vmem>>, vector<128x128xbf16>
    %cst_26 = arith.constant dense<0.000000e+00> : vector<32x128xf32>
    %52 = tpu.matmul %50, %51, %cst_26 {dimension_numbers = #tpu.dot_dimension_numbers<[1], [0], [0], [1], [0, 0, 1, 1], [], []>} : vector<32x128xbf16>, vector<128x128xbf16>, vector<32x128xf32> -> vector<32x128xf32>
    %c0_27 = arith.constant 0 : index
    %c0_28 = arith.constant 0 : index
    %53 = vector.load %arg6[%c0_27, %c0_28] : memref<1x128xf32, #tpu.memory_space<vmem>>, vector<1x128xf32>
    %cst_29 = arith.constant dense<0.000000e+00> : vector<1x32xf32>
    %54 = tpu.matmul %53, %52, %cst_29 {dimension_numbers = #tpu.dot_dimension_numbers<[1], [1], [0], [0], [0, 0, 1, 0], [], []>} : vector<1x128xf32>, vector<32x128xf32>, vector<1x32xf32> -> vector<1x32xf32>
    %55 = arith.truncf %52 : vector<32x128xf32> to vector<32x128xbf16>
    %c0_30 = arith.constant 0 : index
    %c0_31 = arith.constant 0 : index
    %56 = vector.load %arg12[%c0_30, %c0_31] : memref<32x128xbf16, #tpu.memory_space<vmem>>, vector<32x128xbf16>
    tpu.vector_store %arg12[%c0_30, %c0_31], %55 {strides = array<i32>} : memref<32x128xbf16, #tpu.memory_space<vmem>>, vector<32x128xbf16>,
    %c0_32 = arith.constant 0 : index
    %c0_33 = arith.constant 0 : index
    %57 = vector.load %arg7[%c0_32, %c0_33] : memref<1x128xf32, #tpu.memory_space<vmem>>, vector<1x128xf32>
    %c0_i32_34 = arith.constant 0 : i32
    %c32_i32_35 = arith.constant 32 : i32
    %58 = arith.muli %c0_i32_34, %c32_i32_35 : i32
    %59 = tpu.assume_multiple %58, 32 : i32
    %60 = arith.index_cast %59 : i32 to index
    %c0_36 = arith.constant 0 : index
    %61 = vector.load %arg12[%60, %c0_36] : memref<32x128xbf16, #tpu.memory_space<vmem>>, vector<32x128xbf16>
    %62 = vector.extract_strided_slice %61 {offsets = [0, 127], sizes = [32, 1], strides = [1, 1]} : vector<32x128xbf16> to vector<32x1xbf16>
    %63 = arith.extf %62 : vector<32x1xbf16> to vector<32x1xf32>
    %64 = vector.broadcast %63 : vector<32x1xf32> to vector<32x32xf32>
    %65 = vector.broadcast %54 : vector<1x32xf32> to vector<32x32xf32>
    %66 = arith.addf %64, %65 : vector<32x32xf32>
    %cst_37 = arith.constant 2.000000e-01 : f32
    %67 = vector.broadcast %cst_37 : f32 to vector<32x32xf32>
    %68 = arith.mulf %67, %66 : vector<32x32xf32>
    %69 = arith.maximumf %66, %68 : vector<32x32xf32>
    %70 = arith.index_cast %59 : i32 to index
    %c0_38 = arith.constant 0 : index
    %71 = vector.load %arg1[%70, %c0_38] : memref<32x32xbf16, #tpu.memory_space<vmem>>, vector<32x32xbf16>
    %72 = arith.extf %71 : vector<32x32xbf16> to vector<32x32xf32>
    %73 = arith.addf %69, %72 : vector<32x32xf32>
    %cst_39 = arith.constant dense<0xFF800000> : vector<32xf32>
    %74 = vector.multi_reduction <maximumf>, %73, %cst_39 [1] : vector<32x32xf32> to vector<32xf32>
    %75 = vector.shape_cast %74 : vector<32xf32> to vector<32x1xf32>
    %76 = vector.broadcast %75 : vector<32x1xf32> to vector<32x32xf32>
    %77 = arith.subf %73, %76 : vector<32x32xf32>
    %78 = math.exp %77 : vector<32x32xf32>
    %cst_40 = arith.constant dense<0.000000e+00> : vector<32xf32>
    %79 = vector.multi_reduction <add>, %78, %cst_40 [1] : vector<32x32xf32> to vector<32xf32>
    %80 = vector.shape_cast %79 : vector<32xf32> to vector<32x1xf32>
    %81 = arith.truncf %78 : vector<32x32xf32> to vector<32x32xbf16>
    %c0_41 = arith.constant 0 : index
    %c0_42 = arith.constant 0 : index
    %82 = vector.load %arg12[%c0_41, %c0_42] : memref<32x128xbf16, #tpu.memory_space<vmem>>, vector<32x128xbf16>
    %cst_43 = arith.constant dense<0.000000e+00> : vector<32x128xf32>
    %83 = tpu.matmul %81, %82, %cst_43 {dimension_numbers = #tpu.dot_dimension_numbers<[1], [0], [0], [1], [0, 0, 1, 1], [], []>} : vector<32x32xbf16>, vector<32x128xbf16>, vector<32x128xf32> -> vector<32x128xf32>
    %84 = tpu.reciprocal %80 {approx = true} : vector<32x1xf32> -> vector<32x1xf32>
    %85 = vector.broadcast %84 : vector<32x1xf32> to vector<32x128xf32>
    %86 = arith.mulf %83, %85 : vector<32x128xf32>
    %87 = vector.broadcast %57 : vector<1x128xf32> to vector<32x128xf32>
    %88 = arith.addf %86, %87 : vector<32x128xf32>
    %cst_44 = arith.constant 0.000000e+00 : f32
    %89 = vector.broadcast %cst_44 : f32 to vector<32x128xf32>
    %90 = arith.cmpf ogt, %88, %89 : vector<32x128xf32>
    %cst_45 = arith.constant 0.000000e+00 : f32
    %91 = vector.broadcast %cst_45 : f32 to vector<32x128xf32>
    %92 = arith.minimumf %88, %91 : vector<32x128xf32>
    %93 = math.exp %92 : vector<32x128xf32>
    %cst_46 = arith.constant 1.000000e+00 : f32
    %94 = vector.broadcast %cst_46 : f32 to vector<32x128xf32>
    %95 = arith.subf %93, %94 : vector<32x128xf32>
    %96 = arith.select %90, %88, %95 : vector<32x128xi1>, vector<32x128xf32>
    %97 = arith.index_cast %59 : i32 to index
    %c0_47 = arith.constant 0 : index
    %98 = vector.load %arg11[%97, %c0_47] : memref<32x128xf32, #tpu.memory_space<vmem>>, vector<32x128xf32>
    tpu.vector_store %arg11[%97, %c0_47], %96 {strides = array<i32>} : memref<32x128xf32, #tpu.memory_space<vmem>>, vector<32x128xf32>,
    %c1_i32_48 = arith.constant 1 : i32
    %c0_49 = arith.constant 0 : index
    %c0_50 = arith.constant 0 : index
    %99 = vector.load %arg11[%c0_49, %c0_50] : memref<32x128xf32, #tpu.memory_space<vmem>>, vector<32x128xf32>
    %100 = arith.truncf %99 : vector<32x128xf32> to vector<32x128xbf16>
    %c0_51 = arith.constant 0 : index
    %c0_52 = arith.constant 0 : index
    %101 = vector.load %arg8[%c0_51, %c0_52] : memref<128x128xbf16, #tpu.memory_space<vmem>>, vector<128x128xbf16>
    %cst_53 = arith.constant dense<0.000000e+00> : vector<32x128xf32>
    %102 = tpu.matmul %100, %101, %cst_53 {dimension_numbers = #tpu.dot_dimension_numbers<[1], [0], [0], [1], [0, 0, 1, 1], [], []>} : vector<32x128xbf16>, vector<128x128xbf16>, vector<32x128xf32> -> vector<32x128xf32>
    %c0_54 = arith.constant 0 : index
    %c0_55 = arith.constant 0 : index
    %103 = vector.load %arg9[%c0_54, %c0_55] : memref<1x128xf32, #tpu.memory_space<vmem>>, vector<1x128xf32>
    %cst_56 = arith.constant dense<0.000000e+00> : vector<1x32xf32>
    %104 = tpu.matmul %103, %102, %cst_56 {dimension_numbers = #tpu.dot_dimension_numbers<[1], [1], [0], [0], [0, 0, 1, 0], [], []>} : vector<1x128xf32>, vector<32x128xf32>, vector<1x32xf32> -> vector<1x32xf32>
    %105 = arith.truncf %102 : vector<32x128xf32> to vector<32x128xbf16>
    %c0_57 = arith.constant 0 : index
    %c0_58 = arith.constant 0 : index
    %106 = vector.load %arg12[%c0_57, %c0_58] : memref<32x128xbf16, #tpu.memory_space<vmem>>, vector<32x128xbf16>
    tpu.vector_store %arg12[%c0_57, %c0_58], %105 {strides = array<i32>} : memref<32x128xbf16, #tpu.memory_space<vmem>>, vector<32x128xbf16>,
    %c0_59 = arith.constant 0 : index
    %c0_60 = arith.constant 0 : index
    %107 = vector.load %arg10[%c0_59, %c0_60] : memref<1x128xf32, #tpu.memory_space<vmem>>, vector<1x128xf32>
    %c0_i32_61 = arith.constant 0 : i32
    %c32_i32_62 = arith.constant 32 : i32
    %108 = arith.muli %c0_i32_61, %c32_i32_62 : i32
    %109 = tpu.assume_multiple %108, 32 : i32
    %110 = arith.index_cast %109 : i32 to index
    %c0_63 = arith.constant 0 : index
    %111 = vector.load %arg12[%110, %c0_63] : memref<32x128xbf16, #tpu.memory_space<vmem>>, vector<32x128xbf16>
    %112 = vector.extract_strided_slice %111 {offsets = [0, 127], sizes = [32, 1], strides = [1, 1]} : vector<32x128xbf16> to vector<32x1xbf16>
    %113 = arith.extf %112 : vector<32x1xbf16> to vector<32x1xf32>
    %114 = vector.broadcast %113 : vector<32x1xf32> to vector<32x32xf32>
    %115 = vector.broadcast %104 : vector<1x32xf32> to vector<32x32xf32>
    %116 = arith.addf %114, %115 : vector<32x32xf32>
    %cst_64 = arith.constant 2.000000e-01 : f32
    %117 = vector.broadcast %cst_64 : f32 to vector<32x32xf32>
    %118 = arith.mulf %117, %116 : vector<32x32xf32>
    %119 = arith.maximumf %116, %118 : vector<32x32xf32>
    %120 = arith.index_cast %109 : i32 to index
    %c0_65 = arith.constant 0 : index
    %121 = vector.load %arg1[%120, %c0_65] : memref<32x32xbf16, #tpu.memory_space<vmem>>, vector<32x32xbf16>
    %122 = arith.extf %121 : vector<32x32xbf16> to vector<32x32xf32>
    %123 = arith.addf %119, %122 : vector<32x32xf32>
    %cst_66 = arith.constant dense<0xFF800000> : vector<32xf32>
    %124 = vector.multi_reduction <maximumf>, %123, %cst_66 [1] : vector<32x32xf32> to vector<32xf32>
    %125 = vector.shape_cast %124 : vector<32xf32> to vector<32x1xf32>
    %126 = vector.broadcast %125 : vector<32x1xf32> to vector<32x32xf32>
    %127 = arith.subf %123, %126 : vector<32x32xf32>
    %128 = math.exp %127 : vector<32x32xf32>
    %cst_67 = arith.constant dense<0.000000e+00> : vector<32xf32>
    %129 = vector.multi_reduction <add>, %128, %cst_67 [1] : vector<32x32xf32> to vector<32xf32>
    %130 = vector.shape_cast %129 : vector<32xf32> to vector<32x1xf32>
    %131 = arith.truncf %128 : vector<32x32xf32> to vector<32x32xbf16>
    %c0_68 = arith.constant 0 : index
    %c0_69 = arith.constant 0 : index
    %132 = vector.load %arg12[%c0_68, %c0_69] : memref<32x128xbf16, #tpu.memory_space<vmem>>, vector<32x128xbf16>
    %cst_70 = arith.constant dense<0.000000e+00> : vector<32x128xf32>
    %133 = tpu.matmul %131, %132, %cst_70 {dimension_numbers = #tpu.dot_dimension_numbers<[1], [0], [0], [1], [0, 0, 1, 1], [], []>} : vector<32x32xbf16>, vector<32x128xbf16>, vector<32x128xf32> -> vector<32x128xf32>
    %134 = tpu.reciprocal %130 {approx = true} : vector<32x1xf32> -> vector<32x1xf32>
    %135 = vector.broadcast %134 : vector<32x1xf32> to vector<32x128xf32>
    %136 = arith.mulf %133, %135 : vector<32x128xf32>
    %137 = vector.broadcast %107 : vector<1x128xf32> to vector<32x128xf32>
    %138 = arith.addf %136, %137 : vector<32x128xf32>
    %139 = arith.index_cast %109 : i32 to index
    %c0_71 = arith.constant 0 : index
    %140 = vector.load %arg11[%139, %c0_71] : memref<32x128xf32, #tpu.memory_space<vmem>>, vector<32x128xf32>
    tpu.vector_store %arg11[%139, %c0_71], %138 {strides = array<i32>} : memref<32x128xf32, #tpu.memory_space<vmem>>, vector<32x128xf32>,
    %c1_i32_72 = arith.constant 1 : i32
    return
  }
}

</mosaic_0001>

<bundles_post_ra>
// kernel: gat_apply.1
= control target key start
LH: loop header
LB: loop body
LE: loop exit
PB: predicated region body
PF: predicated region fallthrough
CT: control target
= control target key end

     0   :  { %16 = vsyncpa [#allocation4], 0  ;;  %s2063_s0 = inlined_call_operand.vmem [shape: bf16[32,128], index: 0, kind: input, shape index: {}]   ;;  %s2064_s1 = inlined_call_operand.vmem [shape: bf16[32,32], index: 1, kind: input, shape index: {}]   ;;  %s2065_s2 = inlined_call_operand.vmem [shape: bf16[128,128], index: 2, kind: input, shape index: {}]   ;;  %s2066_s3 = inlined_call_operand.vmem [shape: f32[1,128], index: 3, kind: input, shape index: {}]   ;;  %s2067_s4 = inlined_call_operand.vmem [shape: f32[1,128], index: 4, kind: input, shape index: {}]   ;;  %s2068_s5 = inlined_call_operand.hbm [shape: bf16[128,128], index: 5, kind: input, shape index: {}]   ;;  %s2069_s6 = inlined_call_operand.vmem [shape: f32[1,128], index: 6, kind: input, shape index: {}]   ;;  %s2070_s7 = inlined_call_operand.vmem [shape: f32[1,128], index: 7, kind: input, shape index: {}]   ;;  %s2071_s8 = inlined_call_operand.hbm [shape: bf16[128,128], index: 8, kind: input, shape index: {}]   ;;  %s2072_s9 = inlined_call_operand.vmem [shape: f32[1,128], index: 9, kind: input, shape index: {}]   ;;  %s2073_s10 = inlined_call_operand.vmem [shape: f32[1,128], index: 10, kind: input, shape index: {}]   ;;  %s2074_s11 = inlined_call_operand.vmem [shape: f32[32,128], index: 11, kind: output, shape index: {}]  }
   0x1   :  { %17 = vsyncpa [#allocation6], 0  ;;  %s1851_s17 = smov [#allocation3]  }
   0x2   :  { %s33_s18 = sshll.u32 %s1851_s17, 4  ;;  %s34_s18 = int_to_ptr.vmem [resolvable:$true] %s33_s18 }
   0x3   :  { %s1815_s19 = scalar_lea.vmem %s34_s18, 1024  ;;  %p1820_p1 = scmp.lt.s32.totalorder %s34_s18, %s34_s18 }
   0x4   :  { %p1816_p0 = scmp.ne.s32.totalorder %s34_s18, %s1815_s19  ;;  %p1821_p2 = scmp.lt.s32.totalorder %s1815_s19, %s1815_s19 }
   0x6   :  { %p1822_p3 = por %p1821_p2, %p1820_p1 }
   0x8   :  { %p1823_p4 = pnand %p1822_p3, %p1816_p0 }
   0xa   :  { %1826 = shalt.err (!%p1823_p4)
}
   0xb   :  { %s1852_s20 = smov 64   ;;  %s1853_s21 = smov 4  }
   0xc   :  { %39 = dma.hbm_to_vmem [thread:$0]  %s2068_s5, 1024, %s34_s18, [#allocation4], %s1852_s20, %s1852_s20, %s1853_s21  }
   0xd   :  { %s1854_s24 = smov [#allocation5]  }
   0xe   :  { %s49_s25 = sshll.u32 %s1854_s24, 4  ;;  %s50_s25 = int_to_ptr.vmem [resolvable:$true] %s49_s25 }
   0xf   :  { %s1835_s26 = scalar_lea.vmem %s50_s25, 1024  ;;  %p1840_p6 = scmp.lt.s32.totalorder %s50_s25, %s50_s25 }
  0x10   :  { %p1836_p5 = scmp.ne.s32.totalorder %s50_s25, %s1835_s26  ;;  %p1841_p7 = scmp.lt.s32.totalorder %s1835_s26, %s1835_s26 }
  0x12   :  { %p1842_p8 = por %p1841_p7, %p1840_p6 }
  0x14   :  { %p1843_p9 = pnand %p1842_p8, %p1836_p5 }
  0x16   :  { %1846 = shalt.err (!%p1843_p9)
}
  0x17   :  { %55 = dma.hbm_to_vmem [thread:$0]  %s2071_s8, 1024, %s50_s25, [#allocation6], %s1852_s20, %s1852_s20, %s1853_s21  }
  0x18   :  { %1847 = dma.done.wait [#allocation4], 1024  }
  0x19   :  { %1848 = vsyncadd [#allocation4], 4294966272 }
  0x1a   :  { %1849 = dma.done.wait [#allocation6], 1024  }
  0x1b   :  { %1850 = vsyncadd [#allocation6], 4294966272  ;;  %v1699_v0 = vld [vmem:[%s2065_s2 + $0x38] sm:$0xff]   ;;  %v1700_v1 = vld [vmem:[%s2065_s2 + $0x30] sm:$0xff]   ;;  %v1855_v10 = vmov 0.0   ;;  %v1856_v11 = vmov 127   ;;  %v316_v23 = vlaneseq }
  0x1c   :  { %1543 = vmatprep.subr.bf16.mxu0 %v1699_v0  ;;  %v1701_v2 = vld [vmem:[%s2065_s2 + $0x28] sm:$0xff]   ;;  %v1702_v3 = vld [vmem:[%s2065_s2 + $0x20] sm:$0xff]   ;;  %v1703_v5 = vld [vmem:[%s2065_s2 + $0x18] sm:$0xff]   ;;  %1563 = vmatprep.subr.mxu1 %v1855_v10  ;;  %vm1857_vm0 = vmmov 0   ;;  %vm344_vm1 = vcmask 261120  }
  0x1d   :  { %1544 = vmatpush3.bf16.msra.mxu0 %v1699_v0  ;;  %v1707_v4 = vld [vmem:[%s2063_s0] sm:$0xff]   ;;  %v1704_v6 = vld [vmem:[%s2065_s2 + $0x10] sm:$0xff]   ;;  %v1705_v7 = vld [vmem:[%s2065_s2 + $0x8] sm:$0xff]   ;;  %1667 = vset.pattern.permute.xlu0 %v1856_v11  ;;  %v317_v25 = vshrl.u32 %v316_v23, 7 }
  0x1e   :  { %1545 = vmatprep.subr.bf16.mxu0 %v1700_v1  ;;  %1559 = vmatprep.mubr.bf16.mxu0 %v1707_v4  ;;  %v1706_v8 = vld [vmem:[%s2065_s2] sm:$0xff]   ;;  %v1708_v9 = vld [vmem:[%s2063_s0 + $0x8] sm:$0xff]   ;;  %v1718_v23 = vld [vmem:[#allocation3] sm:$0xff]  }
  0x1f   :  { %1678 = vset.pattern.permute.xlu1 %v1856_v11  ;;  %1571 = vmatprep.mubr.msk.f32.mxu1 %vm1857_vm0, %v1855_v10  ;;  %v196_v21 = vld [vmem:[%s2066_s3] sm:$0x1]  ;;  %v1966_v26 = vsub.s32 0, %v317_v25  ;;  %v1479_v30 = vld [vmem:[%s2064_s1 + $0x8] sm:$0xff]  }
  0x20   :  { %v1418_v32 = vld [vmem:[%s2064_s1] sm:$0xff]   ;;  %v1975_v37 = vunpack.c.l.bf16 %v1479_v30  ;;  %v1983_v49 = vunpack.c.h.bf16 %v1479_v30 }
  0x21   :  { %1546 = vmatpush3.bf16.msra.mxu0 %v1700_v1  ;;  %v1977_v40 = vunpack.c.l.bf16 %v1418_v32  ;;  %v1979_v42 = vunpack.c.h.bf16 %v1418_v32  ;;  %v1344_v30 = vld [vmem:[%s2067_s4] ss:$0 sm:$0xff] }
  0x22   :  { %1547 = vmatprep.subr.bf16.mxu0 %v1701_v2 }
  0x25   :  { %1548 = vmatpush3.bf16.msra.mxu0 %v1701_v2 }
  0x26   :  { %1549 = vmatprep.subr.bf16.mxu0 %v1702_v3 }
  0x29   :  { %1550 = vmatpush3.bf16.msra.mxu0 %v1702_v3 }
  0x2a   :  { %1551 = vmatprep.subr.bf16.mxu0 %v1703_v5 }
  0x2d   :  { %1552 = vmatpush3.bf16.msra.mxu0 %v1703_v5 }
  0x2e   :  { %1553 = vmatprep.subr.bf16.mxu0 %v1704_v6 }
  0x31   :  { %1554 = vmatpush3.bf16.msra.mxu0 %v1704_v6 }
  0x32   :  { %1555 = vmatprep.subr.bf16.mxu0 %v1705_v7 }
  0x35   :  { %1556 = vmatpush3.bf16.msra.mxu0 %v1705_v7 }
  0x36   :  { %1557 = vmatprep.subr.bf16.mxu0 %v1706_v8 }
  0x39   :  { %1558 = vmatpush3.bf16.msra.mxu0 %v1706_v8 }
  0x3a   :  { %1602 = vmatprep.subr.mxu0 %v1855_v10 }
  0x3c   :  { %1560 = vmatmul.mubr.bf16.vlgmr.msra.gmra.mxu0 %v1708_v9 }
  0x3d   :  { %1610 = vmatprep.mubr.msk.f32.mxu0 %vm1857_vm0, %v1855_v10 }
  0xfc   :  { %v1561_v12 = vpop.f32.mrf.mxu0 }
  0xfe   :  { %v181_v13 = vpop.f32.mrf.mxu0 }
 0x100   :  { %v1562_v14 = vpop.f32.mrf.mxu0 }
 0x101   :  { %v1407_v15 = vpack.c.bf16 %v1562_v14, %v1561_v12  ;;  %1564 = vmatpush3.xpose.msra.mxu1 %v1562_v14  ;;  %v1673_v19 = vpack.i.bf16 %v1562_v14, %v1561_v12 }
 0x102   :  { %v184_v16 = vpop.f32.mrf.mxu0  ;;  %1565 = vmatprep.subr.mxu1 %v1855_v10 }
 0x103   :  { %1477 = vst [vmem:[#allocation2 + $0x8] sm:$0xff] %v1407_v15   ;;  %v1402_v17 = vpack.c.bf16 %v184_v16, %v181_v13  ;;  %v1668_v18 = vpack.i.bf16 %v184_v16, %v181_v13 }
 0x105   :  { %1403 = vst [vmem:[#allocation2] sm:$0xff] %v1402_v17   ;;  %1566 = vmatpush3.xpose.msra.mxu1 %v1561_v12  ;;  %1669 = vperm.xlu0 %1667, %v1668_v18   ;;  %v1712_v17 = vld [vmem:[#allocation3 + $0x30] sm:$0xff]   ;;  %v1713_v18 = vld [vmem:[#allocation3 + $0x28] sm:$0xff]  }
 0x106   :  { %1567 = vmatprep.subr.mxu1 %v1855_v10 }
 0x109   :  { %1568 = vmatpush3.xpose.msra.mxu1 %v184_v16  ;;  %1674 = vperm.xlu0 %1667, %v1673_v19   ;;  %v1711_v16 = vld [vmem:[#allocation3 + $0x38] sm:$0xff]   ;;  %v1714_v19 = vld [vmem:[#allocation3 + $0x20] sm:$0xff]  }
 0x10a   :  { %1569 = vmatprep.subr.mxu1 %v1855_v10  ;;  %v1709_v20 = vld [vmem:[#allocation2 + $0x8] sm:$0xff]  }
 0x10c   :  { %v1710_v22 = vld [vmem:[#allocation2] sm:$0xff]  }
 0x10d   :  { %1570 = vmatpush3.xpose.msra.mxu1 %v181_v13 }
 0x10e   :  { %1574 = vmatprep.subr.bf16.mxu1 %v1709_v20 }
 0x110   :  { %1572 = vmatmul.mubr.f32.vlgmr.msra.gmra.mxu1 %v196_v21  ;;  %v1716_v21 = vld [vmem:[#allocation3 + $0x10] sm:$0xff]  }
 0x111   :  { %1575 = vmatpush3.bf16.msra.mxu1 %v1709_v20  ;;  %v1715_v20 = vld [vmem:[#allocation3 + $0x18] sm:$0xff]  }
 0x112   :  { %1576 = vmatprep.subr.bf16.mxu1 %v1710_v22 }
 0x115   :  { %1577 = vmatpush3.bf16.msra.mxu1 %v1710_v22  ;;  %v1717_v22 = vld [vmem:[#allocation3 + $0x8] sm:$0xff]  }
 0x116   :  { %1582 = vmatprep.subr.bf16.mxu1 %v1711_v16 }
 0x180   :  { %v1670_v24 = vpop.permute.xlu0 %1669 }
 0x184   :  { %v1675_v27 = vpop.permute.xlu0 %1674 }
 0x1d0   :  { %v263_v28 = vpop.f32.mrf.mxu1 }
 0x1d1   :  { %v319_v29 = vrot.slane %v263_v28, %v1966_v26 }
 0x1d2   :  { %v1573_v31 = vpop.f32.mrf.mxu1 }
 0x1d3   :  { %v1795_v33 = vadd.low.f32.bf16 %v319_v29, %v1675_v27  ;;  %v1796_v34 = vadd.low.f32.bf16 %v319_v29, %v1670_v24  ;;  %v1797_v35 = vadd.high.f32.bf16 %v319_v29, %v1670_v24  ;;  %v1798_v36 = vadd.high.f32.bf16 %v319_v29, %v1675_v27 }
 0x1d5   :  { %v326_v38 = vmul.f32 0.2, %v1795_v33  ;;  %v324_v39 = vmul.f32 0.2, %v1796_v34  ;;  %v325_v41 = vmul.f32 0.2, %v1797_v35 }
 0x1d6   :  { %v327_v46 = vmul.f32 0.2, %v1798_v36 }
 0x1d7   :  { %v330_v43 = vmax.f32 %v1795_v33, %v326_v38  ;;  %v328_v44 = vmax.f32 %v1796_v34, %v324_v39  ;;  %v329_v45 = vmax.f32 %v1797_v35, %v325_v41 }
 0x1d8   :  { %v331_v53 = vmax.f32 %v1798_v36, %v327_v46 }
 0x1d9   :  { %v342_v47 = vadd.f32 %v1975_v37, %v330_v43  ;;  %v340_v48 = vadd.f32 %v1977_v40, %v328_v44  ;;  %v341_v52 = vadd.f32 %v1979_v42, %v329_v45 }
 0x1da   :  { %v343_v55 = vadd.f32 %v1983_v49, %v331_v53 }
 0x1db   :  { %v351_v50 = vsel %vm344_vm1, %v342_v47, -inf  ;;  %v345_v51 = vsel %vm344_vm1, %v340_v48, -inf  ;;  %v348_v54 = vsel %vm344_vm1, %v341_v52, -inf }
 0x1dc   :  { %352 = vmax.xlane.f32.xlu0 %v351_v50  ;;  %346 = vmax.xlane.f32.xlu1 %v345_v51  ;;  %v354_v56 = vsel %vm344_vm1, %v343_v55, -inf }
 0x1e0   :  { %349 = vmax.xlane.f32.xlu1 %v348_v54 }
 0x1e4   :  { %355 = vmax.xlane.f32.xlu1 %v354_v56 }
 0x265   :  { %v347_v57 = vpop.xlane.xlu1 %346  ;;  %v353_v58 = vpop.xlane.xlu0 %352 }
 0x266   :  { %v357_v59 = vsub.f32 %v340_v48, %v347_v57  ;;  %v359_v61 = vsub.f32 %v342_v47, %v353_v58 }
 0x268   :  { %v361_v60 = vmul.f32 1.442695, %v357_v59  ;;  %v365_v1 = vmul.f32 1.442695, %v359_v61 }
 0x269   :  { %v350_v62 = vpop.xlane.xlu1 %349 }
 0x26a   :  { %v358_v63 = vsub.f32 %v341_v52, %v350_v62  ;;  %1731 = vpow2.f32 %v361_v60 }
 0x26c   :  { %v363_v0 = vmul.f32 1.442695, %v358_v63 }
 0x26d   :  { %v356_v2 = vpop.xlane.xlu1 %355 }
 0x26e   :  { %1733 = vpow2.f32 %v363_v0  ;;  %v360_v3 = vsub.f32 %v343_v55, %v356_v2 }
 0x26f   :  { %1735 = vpow2.f32 %v365_v1 }
 0x270   :  { %v367_v4 = vmul.f32 1.442695, %v360_v3 }
 0x272   :  { %1737 = vpow2.f32 %v367_v4 }
 0x277   :  { %v1732_v5 = vpop.eup %1731 }
 0x278   :  { %v369_v6 = vsel %vm344_vm1, %v1732_v5, 0.0 }
 0x279   :  { %370 = vadd.xlane.f32.xlu1 %v369_v6 }
 0x27b   :  { %v1734_v7 = vpop.eup %1733 }
 0x27c   :  { %v372_v8 = vsel %vm344_vm1, %v1734_v7, 0.0  ;;  %v381_v9 = vpack.c.bf16 %v1734_v7, %v1732_v5  ;;  %v1736_v11 = vpop.eup %1735 }
 0x27d   :  { %373 = vadd.xlane.f32.xlu1 %v372_v8  ;;  %v375_v14 = vsel %vm344_vm1, %v1736_v11, 0.0 }
 0x27e   :  { %1578 = vmatprep.mubr.msk.bf16.mxu1 %vm344_vm1, %v381_v9 }
 0x27f   :  { %v1738_v12 = vpop.eup %1737 }
 0x280   :  { %v382_v13 = vpack.c.bf16 %v1738_v12, %v1736_v11  ;;  %v378_v15 = vsel %vm344_vm1, %v1738_v12, 0.0 }
 0x281   :  { %376 = vadd.xlane.f32.xlu1 %v375_v14 }
 0x282   :  { %1579 = vmatmul.mubr.msk.bf16.vlgmr.msra.gmra.mxu1 %vm344_vm1, %v382_v13 }
 0x283   :  { %1583 = vmatpush3.bf16.msra.mxu1 %v1711_v16 }
 0x284   :  { %1584 = vmatprep.subr.bf16.mxu1 %v1712_v17 }
 0x285   :  { %379 = vadd.xlane.f32.xlu1 %v378_v15 }
 0x287   :  { %1585 = vmatpush3.bf16.msra.mxu1 %v1712_v17 }
 0x288   :  { %1586 = vmatprep.subr.bf16.mxu1 %v1713_v18 }
 0x28b   :  { %1587 = vmatpush3.bf16.msra.mxu1 %v1713_v18  ;;  %v619_v18 = vld [vmem:[%s2069_s6] sm:$0x1] }
 0x28c   :  { %1588 = vmatprep.subr.bf16.mxu1 %v1714_v19 }
 0x28f   :  { %1589 = vmatpush3.bf16.msra.mxu1 %v1714_v19 }
 0x290   :  { %1590 = vmatprep.subr.bf16.mxu1 %v1715_v20 }
 0x293   :  { %1591 = vmatpush3.bf16.msra.mxu1 %v1715_v20 }
 0x294   :  { %1592 = vmatprep.subr.bf16.mxu1 %v1716_v21 }
 0x297   :  { %1593 = vmatpush3.bf16.msra.mxu1 %v1716_v21 }
 0x298   :  { %1594 = vmatprep.subr.bf16.mxu1 %v1717_v22 }
 0x29b   :  { %1595 = vmatpush3.bf16.msra.mxu1 %v1717_v22 }
 0x29c   :  { %1596 = vmatprep.subr.bf16.mxu1 %v1718_v23 }
 0x29f   :  { %1597 = vmatpush3.bf16.msra.mxu1 %v1718_v23 }
 0x2a0   :  { %1641 = vmatprep.subr.mxu1 %v1855_v10 }
 0x302   :  { %v371_v24 = vpop.xlane.xlu1 %370 }
 0x306   :  { %v374_v25 = vpop.xlane.xlu1 %373 }
 0x30a   :  { %v377_v27 = vpop.xlane.xlu1 %376 }
 0x30b   :  { %1739 = vrcp.f32 %v377_v27 }
 0x30c   :  { %1741 = vrcp.f32 %v371_v24 }
 0x30e   :  { %v380_v28 = vpop.xlane.xlu1 %379 }
 0x30f   :  { %1743 = vrcp.f32 %v380_v28 }
 0x310   :  { %1745 = vrcp.f32 %v374_v25 }
 0x318   :  { %v1740_v29 = vpop.eup %1739 }
 0x319   :  { %v1742_v33 = vpop.eup %1741 }
 0x31c   :  { %v1744_v38 = vpop.eup %1743 }
 0x31d   :  { %v1746_v46 = vpop.eup %1745 }
 0x342   :  { %v1580_v31 = vpop.f32.mrf.mxu1 }
 0x343   :  { %v460_v32 = vmul.f32 %v1740_v29, %v1580_v31 }
 0x344   :  { %v439_v34 = vpop.f32.mrf.mxu1 }
 0x345   :  { %v470_v35 = vadd.f32 %v1344_v30, %v460_v32  ;;  %v458_v36 = vmul.f32 %v1742_v33, %v439_v34 }
 0x346   :  { %v1581_v39 = vpop.f32.mrf.mxu1 }
 0x347   :  { %v478_v41 = vmin.f32 %v470_v35, 0.0  ;;  %v468_v43 = vadd.f32 %v1344_v30, %v458_v36  ;;  %v461_v44 = vmul.f32 %v1744_v38, %v1581_v39  ;;  %vm474_vm5 = vcmp.gt.f32.partialorder %v470_v35, 0.0 }
 0x348   :  { %v442_v45 = vpop.f32.mrf.mxu1 }
 0x349   :  { %v484_v47 = vmul.f32 1.442695, %v478_v41  ;;  %v476_v48 = vmin.f32 %v468_v43, 0.0  ;;  %v471_v50 = vadd.f32 %v1344_v30, %v461_v44  ;;  %v459_v51 = vmul.f32 %v1746_v46, %v442_v45 }
 0x34a   :  { %vm472_vm3 = vcmp.gt.f32.partialorder %v468_v43, 0.0 }
 0x34b   :  { %v480_v52 = vmul.f32 1.442695, %v476_v48  ;;  %v479_v53 = vmin.f32 %v471_v50, 0.0  ;;  %v469_v54 = vadd.f32 %v1344_v30, %v459_v51  ;;  %1747 = vpow2.f32 %v484_v47 }
 0x34c   :  { %vm475_vm2 = vcmp.gt.f32.partialorder %v471_v50, 0.0 }
 0x34d   :  { %v486_v55 = vmul.f32 1.442695, %v479_v53  ;;  %1749 = vpow2.f32 %v480_v52  ;;  %v477_v56 = vmin.f32 %v469_v54, 0.0  ;;  %vm473_vm4 = vcmp.gt.f32.partialorder %v469_v54, 0.0 }
 0x34f   :  { %1751 = vpow2.f32 %v486_v55  ;;  %v482_v57 = vmul.f32 1.442695, %v477_v56 }
 0x351   :  { %1753 = vpow2.f32 %v482_v57 }
 0x358   :  { %v1748_v58 = vpop.eup %1747 }
 0x359   :  { %v1347_v0 = vadd.f32 -1.0, %v1748_v58 }
 0x35a   :  { %v1750_v59 = vpop.eup %1749 }
 0x35b   :  { %v1345_v62 = vadd.f32 -1.0, %v1750_v59  ;;  %v494_v5 = vsel %vm474_vm5, %v470_v35, %v1347_v0 }
 0x35c   :  { %v1752_v60 = vpop.eup %1751 }
 0x35d   :  { %v1348_v61 = vadd.f32 -1.0, %v1752_v60  ;;  %v492_v3 = vsel %vm472_vm3, %v468_v43, %v1345_v62 }
 0x35e   :  { %v1754_v63 = vpop.eup %1753 }
 0x35f   :  { %v1346_v1 = vadd.f32 -1.0, %v1754_v63  ;;  %v495_v2 = vsel %vm475_vm2, %v471_v50, %v1348_v61 }
 0x360   :  { %v505_v7 = vpack.c.bf16 %v495_v2, %v494_v5 }
 0x361   :  { %v493_v4 = vsel %vm473_vm4, %v469_v54, %v1346_v1 }
 0x362   :  { %v504_v6 = vpack.c.bf16 %v493_v4, %v492_v3 }
 0x364   :  { %1598 = vmatprep.mubr.bf16.mxu1 %v504_v6 }
 0x365   :  { %1599 = vmatmul.mubr.bf16.vlgmr.msra.gmra.mxu1 %v505_v7 }
 0x366   :  { %1649 = vmatprep.mubr.msk.f32.mxu1 %vm1857_vm0, %v1855_v10 }
 0x425   :  { %v1600_v8 = vpop.f32.mrf.mxu1 }
 0x427   :  { %v604_v9 = vpop.f32.mrf.mxu1 }
 0x429   :  { %v1601_v11 = vpop.f32.mrf.mxu1 }
 0x42a   :  { %v1433_v12 = vpack.c.bf16 %v1601_v11, %v1600_v8  ;;  %1603 = vmatpush3.xpose.msra.mxu0 %v1601_v11  ;;  %v1684_v15 = vpack.i.bf16 %v1601_v11, %v1600_v8  ;;  %v1723_v11 = vld [vmem:[#allocation5 + $0x28] sm:$0xff]  }
 0x42b   :  { %v607_v13 = vpop.f32.mrf.mxu1  ;;  %1604 = vmatprep.subr.mxu0 %v1855_v10 }
 0x42c   :  { %1480 = vst [vmem:[#allocation2 + $0x8] sm:$0xff] %v1433_v12   ;;  %v1428_v14 = vpack.c.bf16 %v607_v13, %v604_v9  ;;  %1685 = vperm.xlu0 %1667, %v1684_v15   ;;  %v1679_v16 = vpack.i.bf16 %v607_v13, %v604_v9  ;;  %v1724_v12 = vld [vmem:[#allocation5 + $0x20] sm:$0xff]   ;;  %v1727_v15 = vld [vmem:[#allocation5 + $0x8] sm:$0xff]  }
 0x42e   :  { %1429 = vst [vmem:[#allocation2] sm:$0xff] %v1428_v14   ;;  %1605 = vmatpush3.xpose.msra.mxu0 %v1600_v8  ;;  %1680 = vperm.xlu1 %1678, %v1679_v16   ;;  %v1721_v8 = vld [vmem:[#allocation5 + $0x38] sm:$0xff]   ;;  %v1726_v14 = vld [vmem:[#allocation5 + $0x10] sm:$0xff]   ;;  %v1728_v16 = vld [vmem:[#allocation5] sm:$0xff]  }
 0x42f   :  { %1606 = vmatprep.subr.mxu0 %v1855_v10 }
 0x432   :  { %1607 = vmatpush3.xpose.msra.mxu0 %v607_v13  ;;  %v1725_v13 = vld [vmem:[#allocation5 + $0x18] sm:$0xff]  }
 0x433   :  { %1608 = vmatprep.subr.mxu0 %v1855_v10  ;;  %v1719_v17 = vld [vmem:[#allocation2 + $0x8] sm:$0xff]  }
 0x435   :  { %v1720_v19 = vld [vmem:[#allocation2] sm:$0xff]  }
 0x436   :  { %1609 = vmatpush3.xpose.msra.mxu0 %v604_v9  ;;  %v1722_v9 = vld [vmem:[#allocation5 + $0x30] sm:$0xff]  }
 0x437   :  { %1613 = vmatprep.subr.bf16.mxu0 %v1719_v17 }
 0x439   :  { %1611 = vmatmul.mubr.f32.vlgmr.msra.gmra.mxu0 %v619_v18 }
 0x43a   :  { %1614 = vmatpush3.bf16.msra.mxu0 %v1719_v17 }
 0x43b   :  { %1615 = vmatprep.subr.bf16.mxu0 %v1720_v19 }
 0x43e   :  { %1616 = vmatpush3.bf16.msra.mxu0 %v1720_v19 }
 0x43f   :  { %1621 = vmatprep.subr.bf16.mxu0 %v1721_v8 }
 0x4a7   :  { %v1686_v20 = vpop.permute.xlu0 %1685 }
 0x4a9   :  { %v1681_v21 = vpop.permute.xlu1 %1680 }
 0x4f9   :  { %v686_v22 = vpop.f32.mrf.mxu0 }
 0x4fa   :  { %v742_v23 = vrot.slane %v686_v22, %v1966_v26  ;;  %v1365_v22 = vld [vmem:[%s2070_s7] ss:$0 sm:$0xff] }
 0x4fb   :  { %v1612_v24 = vpop.f32.mrf.mxu0 }
 0x4fc   :  { %v1799_v25 = vadd.high.f32.bf16 %v742_v23, %v1681_v21  ;;  %v1800_v27 = vadd.low.f32.bf16 %v742_v23, %v1681_v21  ;;  %v1801_v28 = vadd.low.f32.bf16 %v742_v23, %v1686_v20  ;;  %v1802_v29 = vadd.high.f32.bf16 %v742_v23, %v1686_v20 }
 0x4fe   :  { %v748_v30 = vmul.f32 0.2, %v1799_v25  ;;  %v747_v31 = vmul.f32 0.2, %v1800_v27  ;;  %v749_v32 = vmul.f32 0.2, %v1801_v28 }
 0x4ff   :  { %v750_v36 = vmul.f32 0.2, %v1802_v29 }
 0x500   :  { %v752_v33 = vmax.f32 %v1799_v25, %v748_v30  ;;  %v751_v34 = vmax.f32 %v1800_v27, %v747_v31  ;;  %v753_v35 = vmax.f32 %v1801_v28, %v749_v32 }
 0x501   :  { %v754_v45 = vmax.f32 %v1802_v29, %v750_v36 }
 0x502   :  { %v764_v38 = vadd.f32 %v1979_v42, %v752_v33  ;;  %v763_v39 = vadd.f32 %v1977_v40, %v751_v34  ;;  %v765_v44 = vadd.f32 %v1975_v37, %v753_v35 }
 0x503   :  { %v766_v47 = vadd.f32 %v1983_v49, %v754_v45 }
 0x504   :  { %v770_v41 = vsel %vm344_vm1, %v764_v38, -inf  ;;  %v767_v43 = vsel %vm344_vm1, %v763_v39, -inf  ;;  %v773_v46 = vsel %vm344_vm1, %v765_v44, -inf }
 0x505   :  { %771 = vmax.xlane.f32.xlu0 %v770_v41  ;;  %768 = vmax.xlane.f32.xlu1 %v767_v43  ;;  %v776_v48 = vsel %vm344_vm1, %v766_v47, -inf }
 0x509   :  { %774 = vmax.xlane.f32.xlu1 %v773_v46 }
 0x50d   :  { %777 = vmax.xlane.f32.xlu1 %v776_v48 }
 0x58e   :  { %v772_v50 = vpop.xlane.xlu0 %771  ;;  %v769_v51 = vpop.xlane.xlu1 %768 }
 0x58f   :  { %v780_v52 = vsub.f32 %v764_v38, %v772_v50  ;;  %v779_v53 = vsub.f32 %v763_v39, %v769_v51 }
 0x591   :  { %v785_v54 = vmul.f32 1.442695, %v780_v52  ;;  %v783_v55 = vmul.f32 1.442695, %v779_v53 }
 0x592   :  { %v775_v56 = vpop.xlane.xlu1 %774 }
 0x593   :  { %1755 = vpow2.f32 %v785_v54  ;;  %v781_v57 = vsub.f32 %v765_v44, %v775_v56 }
 0x594   :  { %1757 = vpow2.f32 %v783_v55 }
 0x595   :  { %v787_v58 = vmul.f32 1.442695, %v781_v57 }
 0x596   :  { %v778_v59 = vpop.xlane.xlu1 %777 }
 0x597   :  { %1759 = vpow2.f32 %v787_v58  ;;  %v782_v60 = vsub.f32 %v766_v47, %v778_v59 }
 0x599   :  { %v789_v61 = vmul.f32 1.442695, %v782_v60 }
 0x59b   :  { %1761 = vpow2.f32 %v789_v61 }
 0x5a0   :  { %v1756_v62 = vpop.eup %1755 }
 0x5a1   :  { %v1758_v63 = vpop.eup %1757  ;;  %v794_v0 = vsel %vm344_vm1, %v1756_v62, 0.0 }
 0x5a2   :  { %795 = vadd.xlane.f32.xlu0 %v794_v0  ;;  %v791_v1 = vsel %vm344_vm1, %v1758_v63, 0.0  ;;  %v803_v2 = vpack.c.bf16 %v1756_v62, %v1758_v63 }
 0x5a3   :  { %792 = vadd.xlane.f32.xlu1 %v791_v1 }
 0x5a4   :  { %v1760_v3 = vpop.eup %1759  ;;  %1617 = vmatprep.mubr.msk.bf16.mxu0 %vm344_vm1, %v803_v2 }
 0x5a5   :  { %v797_v4 = vsel %vm344_vm1, %v1760_v3, 0.0 }
 0x5a7   :  { %798 = vadd.xlane.f32.xlu1 %v797_v4 }
 0x5a8   :  { %v1762_v5 = vpop.eup %1761 }
 0x5a9   :  { %v800_v6 = vsel %vm344_vm1, %v1762_v5, 0.0  ;;  %v804_v7 = vpack.c.bf16 %v1762_v5, %v1760_v3 }
 0x5aa   :  { %801 = vadd.xlane.f32.xlu0 %v800_v6 }
 0x5ab   :  { %1618 = vmatmul.mubr.msk.bf16.vlgmr.msra.gmra.mxu0 %vm344_vm1, %v804_v7 }
 0x5ac   :  { %1622 = vmatpush3.bf16.msra.mxu0 %v1721_v8 }
 0x5ad   :  { %1623 = vmatprep.subr.bf16.mxu0 %v1722_v9 }
 0x5b0   :  { %1624 = vmatpush3.bf16.msra.mxu0 %v1722_v9 }
 0x5b1   :  { %1625 = vmatprep.subr.bf16.mxu0 %v1723_v11 }
 0x5b4   :  { %1626 = vmatpush3.bf16.msra.mxu0 %v1723_v11  ;;  %v1041_v11 = vld [vmem:[%s2072_s9] sm:$0x1] }
 0x5b5   :  { %1627 = vmatprep.subr.bf16.mxu0 %v1724_v12 }
 0x5b8   :  { %1628 = vmatpush3.bf16.msra.mxu0 %v1724_v12 }
 0x5b9   :  { %1629 = vmatprep.subr.bf16.mxu0 %v1725_v13 }
 0x5bc   :  { %1630 = vmatpush3.bf16.msra.mxu0 %v1725_v13 }
 0x5bd   :  { %1631 = vmatprep.subr.bf16.mxu0 %v1726_v14 }
 0x5c0   :  { %1632 = vmatpush3.bf16.msra.mxu0 %v1726_v14 }
 0x5c1   :  { %1633 = vmatprep.subr.bf16.mxu0 %v1727_v15 }
 0x5c4   :  { %1634 = vmatpush3.bf16.msra.mxu0 %v1727_v15 }
 0x5c5   :  { %1635 = vmatprep.subr.bf16.mxu0 %v1728_v16 }
 0x5c8   :  { %1636 = vmatpush3.bf16.msra.mxu0 %v1728_v16 }
 0x62b   :  { %v796_v18 = vpop.xlane.xlu0 %795 }
 0x62c   :  { %v793_v17 = vpop.xlane.xlu1 %792 }
 0x630   :  { %v799_v19 = vpop.xlane.xlu1 %798 }
 0x631   :  { %1763 = vrcp.f32 %v799_v19 }
 0x632   :  { %1765 = vrcp.f32 %v793_v17 }
 0x633   :  { %v802_v20 = vpop.xlane.xlu0 %801 }
 0x634   :  { %1767 = vrcp.f32 %v802_v20 }
 0x635   :  { %1769 = vrcp.f32 %v796_v18 }
 0x63e   :  { %v1764_v21 = vpop.eup %1763 }
 0x63f   :  { %v1766_v25 = vpop.eup %1765 }
 0x641   :  { %v1768_v30 = vpop.eup %1767 }
 0x642   :  { %v1770_v36 = vpop.eup %1769 }
 0x66b   :  { %v1619_v23 = vpop.f32.mrf.mxu0 }
 0x66c   :  { %v882_v24 = vmul.f32 %v1764_v21, %v1619_v23 }
 0x66d   :  { %v861_v27 = vpop.f32.mrf.mxu0 }
 0x66e   :  { %v892_v28 = vadd.f32 %v1365_v22, %v882_v24  ;;  %v880_v29 = vmul.f32 %v1766_v25, %v861_v27 }
 0x66f   :  { %v1620_v31 = vpop.f32.mrf.mxu0 }
 0x670   :  { %v900_v32 = vmin.f32 %v892_v28, 0.0  ;;  %v890_v33 = vadd.f32 %v1365_v22, %v880_v29  ;;  %v883_v34 = vmul.f32 %v1768_v30, %v1620_v31  ;;  %vm896_vm9 = vcmp.gt.f32.partialorder %v892_v28, 0.0 }
 0x671   :  { %v864_v35 = vpop.f32.mrf.mxu0 }
 0x672   :  { %v906_v38 = vmul.f32 1.442695, %v900_v32  ;;  %v898_v39 = vmin.f32 %v890_v33, 0.0  ;;  %v893_v41 = vadd.f32 %v1365_v22, %v883_v34  ;;  %v881_v43 = vmul.f32 %v1770_v36, %v864_v35 }
 0x673   :  { %vm894_vm7 = vcmp.gt.f32.partialorder %v890_v33, 0.0 }
 0x674   :  { %v902_v44 = vmul.f32 1.442695, %v898_v39  ;;  %v901_v45 = vmin.f32 %v893_v41, 0.0  ;;  %v891_v46 = vadd.f32 %v1365_v22, %v881_v43  ;;  %1771 = vpow2.f32 %v906_v38 }
 0x675   :  { %vm897_vm6 = vcmp.gt.f32.partialorder %v893_v41, 0.0 }
 0x676   :  { %v908_v47 = vmul.f32 1.442695, %v901_v45  ;;  %1773 = vpow2.f32 %v902_v44  ;;  %v899_v48 = vmin.f32 %v891_v46, 0.0  ;;  %vm895_vm8 = vcmp.gt.f32.partialorder %v891_v46, 0.0 }
 0x678   :  { %1775 = vpow2.f32 %v908_v47  ;;  %v904_v50 = vmul.f32 1.442695, %v899_v48 }
 0x67a   :  { %1777 = vpow2.f32 %v904_v50 }
 0x681   :  { %v1772_v51 = vpop.eup %1771 }
 0x682   :  { %v1368_v57 = vadd.f32 -1.0, %v1772_v51 }
 0x683   :  { %v1774_v52 = vpop.eup %1773 }
 0x684   :  { %v1366_v55 = vadd.f32 -1.0, %v1774_v52  ;;  %v916_v62 = vsel %vm896_vm9, %v892_v28, %v1368_v57 }
 0x685   :  { %v1776_v53 = vpop.eup %1775 }
 0x686   :  { %v1369_v54 = vadd.f32 -1.0, %v1776_v53  ;;  %v914_v60 = vsel %vm894_vm7, %v890_v33, %v1366_v55 }
 0x687   :  { %v1778_v56 = vpop.eup %1777 }
 0x688   :  { %v1367_v58 = vadd.f32 -1.0, %v1778_v56  ;;  %v917_v59 = vsel %vm897_vm6, %v893_v41, %v1369_v54 }
 0x689   :  { %v927_v0 = vpack.c.bf16 %v917_v59, %v916_v62 }
 0x68a   :  { %v915_v61 = vsel %vm895_vm8, %v891_v46, %v1367_v58 }
 0x68b   :  { %v926_v63 = vpack.c.bf16 %v915_v61, %v914_v60 }
 0x68d   :  { %1637 = vmatprep.mubr.bf16.mxu0 %v926_v63 }
 0x68e   :  { %1638 = vmatmul.mubr.bf16.vlgmr.msra.gmra.mxu0 %v927_v0  ;;  %v1386_v0 = vld [vmem:[%s2073_s10] ss:$0 sm:$0xff] }
 0x74e   :  { %v1639_v1 = vpop.f32.mrf.mxu0 }
 0x750   :  { %v1026_v2 = vpop.f32.mrf.mxu0 }
 0x752   :  { %v1640_v3 = vpop.f32.mrf.mxu0 }
 0x753   :  { %v1459_v4 = vpack.c.bf16 %v1640_v3, %v1639_v1  ;;  %1642 = vmatpush3.xpose.msra.mxu1 %v1640_v3  ;;  %v1694_v7 = vpack.i.bf16 %v1640_v3, %v1639_v1 }
 0x754   :  { %v1029_v5 = vpop.f32.mrf.mxu0  ;;  %1643 = vmatprep.subr.mxu1 %v1855_v10 }
 0x755   :  { %1483 = vst [vmem:[#allocation2 + $0x8] sm:$0xff] %v1459_v4   ;;  %v1454_v6 = vpack.c.bf16 %v1029_v5, %v1026_v2  ;;  %1695 = vperm.xlu0 %1667, %v1694_v7   ;;  %v1689_v8 = vpack.i.bf16 %v1029_v5, %v1026_v2 }
 0x757   :  { %1455 = vst [vmem:[#allocation2] sm:$0xff] %v1454_v6   ;;  %1644 = vmatpush3.xpose.msra.mxu1 %v1639_v1  ;;  %1690 = vperm.xlu1 %1678, %v1689_v8  }
 0x758   :  { %1645 = vmatprep.subr.mxu1 %v1855_v10 }
 0x75b   :  { %1646 = vmatpush3.xpose.msra.mxu1 %v1029_v5 }
 0x75c   :  { %1647 = vmatprep.subr.mxu1 %v1855_v10  ;;  %v1729_v9 = vld [vmem:[#allocation2 + $0x8] sm:$0xff]  }
 0x75e   :  { %v1730_v12 = vld [vmem:[#allocation2] sm:$0xff]  }
 0x75f   :  { %1648 = vmatpush3.xpose.msra.mxu1 %v1026_v2 }
 0x760   :  { %1652 = vmatprep.subr.bf16.mxu1 %v1729_v9 }
 0x762   :  { %1650 = vmatmul.mubr.f32.vlgmr.msra.gmra.mxu1 %v1041_v11 }
 0x763   :  { %1653 = vmatpush3.bf16.msra.mxu1 %v1729_v9 }
 0x764   :  { %1654 = vmatprep.subr.bf16.mxu1 %v1730_v12 }
 0x767   :  { %1655 = vmatpush3.bf16.msra.mxu1 %v1730_v12 }
 0x7d0   :  { %v1696_v13 = vpop.permute.xlu0 %1695 }
 0x7d2   :  { %v1691_v14 = vpop.permute.xlu1 %1690 }
 0x822   :  { %v1108_v15 = vpop.f32.mrf.mxu1 }
 0x823   :  { %v1164_v16 = vrot.slane %v1108_v15, %v1966_v26 }
 0x824   :  { %v1651_v17 = vpop.f32.mrf.mxu1 }
 0x825   :  { %v1803_v18 = vadd.high.f32.bf16 %v1164_v16, %v1691_v14  ;;  %v1804_v10 = vadd.low.f32.bf16 %v1164_v16, %v1691_v14  ;;  %v1805_v19 = vadd.high.f32.bf16 %v1164_v16, %v1696_v13  ;;  %v1806_v20 = vadd.low.f32.bf16 %v1164_v16, %v1696_v13 }
 0x827   :  { %v1170_v21 = vmul.f32 0.2, %v1803_v18  ;;  %v1169_v22 = vmul.f32 0.2, %v1804_v10  ;;  %v1172_v23 = vmul.f32 0.2, %v1805_v19 }
 0x828   :  { %v1171_v24 = vmul.f32 0.2, %v1806_v20 }
 0x829   :  { %v1174_v25 = vmax.f32 %v1803_v18, %v1170_v21  ;;  %v1173_v27 = vmax.f32 %v1804_v10, %v1169_v22  ;;  %v1176_v28 = vmax.f32 %v1805_v19, %v1172_v23 }
 0x82a   :  { %v1175_v29 = vmax.f32 %v1806_v20, %v1171_v24 }
 0x82b   :  { %v1186_v30 = vadd.f32 %v1979_v42, %v1174_v25  ;;  %v1185_v31 = vadd.f32 %v1977_v40, %v1173_v27  ;;  %v1188_v33 = vadd.f32 %v1983_v49, %v1176_v28 }
 0x82c   :  { %v1187_v34 = vadd.f32 %v1975_v37, %v1175_v29 }
 0x82d   :  { %v1192_v32 = vsel %vm344_vm1, %v1186_v30, -inf  ;;  %v1189_v26 = vsel %vm344_vm1, %v1185_v31, -inf  ;;  %v1198_v35 = vsel %vm344_vm1, %v1188_v33, -inf }
 0x82e   :  { %1193 = vmax.xlane.f32.xlu0 %v1192_v32  ;;  %1190 = vmax.xlane.f32.xlu1 %v1189_v26  ;;  %v1195_v36 = vsel %vm344_vm1, %v1187_v34, -inf }
 0x832   :  { %1199 = vmax.xlane.f32.xlu0 %v1198_v35  ;;  %1196 = vmax.xlane.f32.xlu1 %v1195_v36 }
 0x8b7   :  { %v1194_v38 = vpop.xlane.xlu0 %1193  ;;  %v1191_v42 = vpop.xlane.xlu1 %1190 }
 0x8b8   :  { %v1202_v39 = vsub.f32 %v1186_v30, %v1194_v38  ;;  %v1201_v40 = vsub.f32 %v1185_v31, %v1191_v42 }
 0x8ba   :  { %v1207_v41 = vmul.f32 1.442695, %v1202_v39  ;;  %v1205_v43 = vmul.f32 1.442695, %v1201_v40 }
 0x8bb   :  { %v1200_v44 = vpop.xlane.xlu0 %1199  ;;  %v1197_v45 = vpop.xlane.xlu1 %1196 }
 0x8bc   :  { %1779 = vpow2.f32 %v1207_v41  ;;  %v1204_v49 = vsub.f32 %v1188_v33, %v1200_v44  ;;  %v1203_v46 = vsub.f32 %v1187_v34, %v1197_v45 }
 0x8bd   :  { %1781 = vpow2.f32 %v1205_v43 }
 0x8be   :  { %v1211_v37 = vmul.f32 1.442695, %v1204_v49  ;;  %v1209_v47 = vmul.f32 1.442695, %v1203_v46 }
 0x8c0   :  { %1783 = vpow2.f32 %v1211_v37 }
 0x8c1   :  { %1785 = vpow2.f32 %v1209_v47 }
 0x8c9   :  { %v1780_v48 = vpop.eup %1779 }
 0x8ca   :  { %v1782_v50 = vpop.eup %1781  ;;  %v1216_v51 = vsel %vm344_vm1, %v1780_v48, 0.0 }
 0x8cb   :  { %1217 = vadd.xlane.f32.xlu0 %v1216_v51  ;;  %v1213_v52 = vsel %vm344_vm1, %v1782_v50, 0.0  ;;  %v1225_v53 = vpack.c.bf16 %v1780_v48, %v1782_v50 }
 0x8cc   :  { %1214 = vadd.xlane.f32.xlu1 %v1213_v52 }
 0x8cd   :  { %v1784_v54 = vpop.eup %1783  ;;  %1656 = vmatprep.mubr.msk.bf16.mxu1 %vm344_vm1, %v1225_v53 }
 0x8ce   :  { %v1786_v55 = vpop.eup %1785  ;;  %v1222_v56 = vsel %vm344_vm1, %v1784_v54, 0.0 }
 0x8cf   :  { %1223 = vadd.xlane.f32.xlu0 %v1222_v56  ;;  %v1219_v57 = vsel %vm344_vm1, %v1786_v55, 0.0  ;;  %v1226_v58 = vpack.c.bf16 %v1784_v54, %v1786_v55 }
 0x8d0   :  { %1220 = vadd.xlane.f32.xlu1 %v1219_v57 }
 0x8d1   :  { %1657 = vmatmul.mubr.msk.bf16.vlgmr.msra.gmra.mxu1 %vm344_vm1, %v1226_v58 }
 0x954   :  { %v1218_v60 = vpop.xlane.xlu0 %1217 }
 0x955   :  { %v1215_v59 = vpop.xlane.xlu1 %1214 }
 0x958   :  { %v1224_v62 = vpop.xlane.xlu0 %1223 }
 0x959   :  { %v1221_v61 = vpop.xlane.xlu1 %1220 }
 0x95a   :  { %1787 = vrcp.f32 %v1221_v61 }
 0x95b   :  { %1789 = vrcp.f32 %v1215_v59 }
 0x95c   :  { %1791 = vrcp.f32 %v1224_v62 }
 0x95d   :  { %1793 = vrcp.f32 %v1218_v60 }
 0x967   :  { %v1788_v63 = vpop.eup %1787 }
 0x968   :  { %v1790_v3 = vpop.eup %1789 }
 0x969   :  { %v1792_v7 = vpop.eup %1791 }
 0x96a   :  { %v1794_v12 = vpop.eup %1793 }
 0x991   :  { %v1658_v1 = vpop.f32.mrf.mxu1 }
 0x992   :  { %v1304_v2 = vmul.f32 %v1788_v63, %v1658_v1 }
 0x993   :  { %v1283_v4 = vpop.f32.mrf.mxu1 }
 0x994   :  { %v1314_v5 = vadd.f32 %v1386_v0, %v1304_v2  ;;  %v1302_v6 = vmul.f32 %v1790_v3, %v1283_v4 }
 0x995   :  { %v1659_v8 = vpop.f32.mrf.mxu1 }
 0x996   :  { %1318 = vst [vmem:[%s2074_s11 + $0x10] sm:$0xff] %v1314_v5  ;;  %v1312_v9 = vadd.f32 %v1386_v0, %v1302_v6  ;;  %v1305_v11 = vmul.f32 %v1792_v7, %v1659_v8 }
 0x997   :  { %v1286_v13 = vpop.f32.mrf.mxu1 }
 0x998   :  { %1316 = vst [vmem:[%s2074_s11] sm:$0xff] %v1312_v9  ;;  %v1315_v14 = vadd.f32 %v1386_v0, %v1305_v11  ;;  %v1303_v15 = vmul.f32 %v1794_v12, %v1286_v13 }
 0x99a   :  { %1319 = vst [vmem:[%s2074_s11 + $0x18] sm:$0xff] %v1315_v14  ;;  %v1313_v16 = vadd.f32 %v1386_v0, %v1303_v15 }
 0x99c   :  { %1317 = vst [vmem:[%s2074_s11 + $0x8] sm:$0xff] %v1313_v16 }
 0x99d   :  { %1324 = vsyncpa [#allocation4], 1 }
 0x99e   :  { %1325 = vsyncpa [#allocation6], 1 }

</bundles_post_ra>
